<compile_context>
chip_gen: v6e
topology: v6e:2x2x1
jax: 0.10.0
libtpu: 0.0.40
codegen_flags: <defaults>
</compile_context>

<pallas_src>
import jax
import jax.numpy as jnp
from jax.experimental import pallas as pl
from jax.experimental.pallas import tpu as pltpu


def attn_decoder_kernel(
    next_in_ref, hidden_ref, enc_ref,
    w_attn_ref, b_attn_ref,
    w_comb_ref, b_comb_ref,
    w_ih_ref, w_hh_ref, b_ih_ref, b_hh_ref,
    h_out_ref,
):
    x = next_in_ref[...]                                   # (B, E)
    h = hidden_ref[...]                                    # (B, H)
    enc = enc_ref[...]                                     # (B, L, H)
    E = next_in_ref.shape[1]
    H = hidden_ref.shape[1]

    # attn_weights = softmax(attn(cat(next_input, input_hidden)), dim=1)
    # Split the matmul instead of concatenating along lanes; the weight-row
    # slices are static and sublane-aligned (E, H multiples of 8).
    logits = (
        jnp.dot(x, w_attn_ref[:E, :], preferred_element_type=jnp.float32)
        + jnp.dot(h, w_attn_ref[E:, :], preferred_element_type=jnp.float32)
        + b_attn_ref[...]
    )                                                      # (B, L)
    m = jnp.max(logits, axis=1, keepdims=True)
    ex = jnp.exp(logits - m)
    inv_den = pl.reciprocal(jnp.sum(ex, axis=1, keepdims=True), approx=False)
    attn_w = ex * inv_den                                  # (B, L)

    # bmm(attn_w.unsqueeze(1), encoder_hts).squeeze(1): batched contraction
    # over L on the MXU (no cross-lane broadcast / sublane reduction).
    attn_applied = jnp.einsum(
        "bql,blh->bqh", attn_w[:, None, :], enc,
        preferred_element_type=jnp.float32,
    )[:, 0, :]                                             # (B, H)

    # output = relu(attn_combine(cat(next_input, attn_applied)))
    comb = (
        jnp.dot(x, w_comb_ref[:E, :], preferred_element_type=jnp.float32)
        + jnp.dot(attn_applied, w_comb_ref[E:, :],
                  preferred_element_type=jnp.float32)
        + b_comb_ref[...]
    )                                                      # (B, H)
    gx = jnp.maximum(comb, 0.0)

    # single-step GRU, packed gates (PyTorch order r | z | n).
    gi = jnp.dot(gx, w_ih_ref[...], preferred_element_type=jnp.float32) \
        + b_ih_ref[...]                                    # (B, 3H)
    gh = jnp.dot(h, w_hh_ref[...], preferred_element_type=jnp.float32) \
        + b_hh_ref[...]                                    # (B, 3H)
    r = jax.nn.sigmoid(gi[:, :H] + gh[:, :H])
    z = jax.nn.sigmoid(gi[:, H:2 * H] + gh[:, H:2 * H])
    n = jnp.tanh(gi[:, 2 * H:] + r * gh[:, 2 * H:])
    h_out_ref[...] = (1.0 - z) * n + z * h                 # (B, H)


def attn_decoder_forward(next_input, input_hidden, encoder_hts, params):
    B, H = input_hidden.shape
    args = (
        next_input, input_hidden, encoder_hts,
        params["w_attn"], params["b_attn"],
        params["w_comb"], params["b_comb"],
        params["w_ih"], params["w_hh"], params["b_ih"], params["b_hh"],
    )
    vmem = pl.BlockSpec(memory_space=pltpu.MemorySpace.VMEM)
    h_new = pl.pallas_call(
        attn_decoder_kernel,
        out_shape=jax.ShapeDtypeStruct((B, H), jnp.float32),
        in_specs=[vmem] * len(args),
        out_specs=vmem,
    )(*args)
    # match PyTorch GRU(batch_first=True) outputs: (B, 1, H) and (1, B, H)
    return h_new[:, None, :], h_new[None, :, :]


def init_params(key, input_size, hidden_size, max_length):
    H = hidden_size
    ks = jax.random.split(key, 8)

    def u(k, shape, fan_in):
        bound = 1.0 / float(fan_in) ** 0.5
        return jax.random.uniform(k, shape, jnp.float32, -bound, bound)

    return dict(
        # (in_features, out_features) layouts; GRU columns in r|z|n order.
        w_attn=u(ks[0], (input_size, max_length), input_size),
        b_attn=u(ks[1], (1, max_length), input_size),
        w_comb=u(ks[2], (input_size, hidden_size), input_size),
        b_comb=u(ks[3], (1, hidden_size), input_size),
        w_ih=u(ks[4], (H, 3 * H), H),
        b_ih=u(ks[5], (1, 3 * H), H),
        w_hh=u(ks[6], (H, 3 * H), H),
        b_hh=u(ks[7], (1, 3 * H), H),
    )


def reference_forward(next_input, input_hidden, encoder_hts, p):
    # pure-JAX reference mirroring the PyTorch forward
    H = input_hidden.shape[1]
    cat1 = jnp.concatenate([next_input, input_hidden], axis=1)
    attn_w = jax.nn.softmax(cat1 @ p["w_attn"] + p["b_attn"], axis=1)
    attn_applied = jnp.einsum("bl,blh->bh", attn_w, encoder_hts)
    cat2 = jnp.concatenate([next_input, attn_applied], axis=1)
    gx = jax.nn.relu(cat2 @ p["w_comb"] + p["b_comb"])
    h = input_hidden
    gi = gx @ p["w_ih"] + p["b_ih"]
    gh = h @ p["w_hh"] + p["b_hh"]
    r = jax.nn.sigmoid(gi[:, :H] + gh[:, :H])
    z = jax.nn.sigmoid(gi[:, H:2 * H] + gh[:, H:2 * H])
    n = jnp.tanh(gi[:, 2 * H:] + r * gh[:, 2 * H:])
    h_new = (1.0 - z) * n + z * h
    return h_new[:, None, :], h_new[None, :, :]


if __name__ == "__main__":
    B = 2
    hidden_size = 32
    emb_size = 32                         # next_input feature dim
    input_size = emb_size + hidden_size   # = 64, consistent with cat((x, h), 1)
    max_length = 8

    key = jax.random.PRNGKey(0)
    kp, kx, kh, ke = jax.random.split(key, 4)

    params = init_params(kp, input_size, hidden_size, max_length)
    next_input = jax.random.normal(kx, (B, emb_size), jnp.float32)
    input_hidden = jax.random.normal(kh, (B, hidden_size), jnp.float32)
    encoder_hts = jax.random.normal(ke, (B, max_length, hidden_size), jnp.float32)

    out, hidden = attn_decoder_forward(next_input, input_hidden, encoder_hts, params)
    out = jax.block_until_ready(out)
    hidden = jax.block_until_ready(hidden)

    ref_out, ref_hidden = reference_forward(next_input, input_hidden, encoder_hts, params)
    assert out.shape == (B, 1, hidden_size)
    assert hidden.shape == (1, B, hidden_size)
    assert jnp.allclose(out, ref_out, atol=1e-5, rtol=1e-5)
    assert jnp.allclose(hidden, ref_hidden, atol=1e-5, rtol=1e-5)

    print("KERNEL_OK")
</pallas_src>

<mosaic_0001>
module attributes {stable_mosaic.version = 11 : i64} {
  func.func @attn_decoder_kernel(%arg0: memref<2x32xf32, #tpu.memory_space<vmem>>, %arg1: memref<2x32xf32, #tpu.memory_space<vmem>>, %arg2: memref<2x8x32xf32, #tpu.memory_space<vmem>>, %arg3: memref<64x8xf32, #tpu.memory_space<vmem>>, %arg4: memref<1x8xf32, #tpu.memory_space<vmem>>, %arg5: memref<64x32xf32, #tpu.memory_space<vmem>>, %arg6: memref<1x32xf32, #tpu.memory_space<vmem>>, %arg7: memref<32x96xf32, #tpu.memory_space<vmem>>, %arg8: memref<32x96xf32, #tpu.memory_space<vmem>>, %arg9: memref<1x96xf32, #tpu.memory_space<vmem>>, %arg10: memref<1x96xf32, #tpu.memory_space<vmem>>, %arg11: memref<2x32xf32, #tpu.memory_space<vmem>>) attributes {dimension_semantics = [], scalar_prefetch = 0 : i64, scratch_operands = 0 : i64, tpu.core_type = #tpu.core_type<tc>} {
    %c0 = arith.constant 0 : index
    %c0_0 = arith.constant 0 : index
    %0 = vector.load %arg0[%c0, %c0_0] : memref<2x32xf32, #tpu.memory_space<vmem>>, vector<2x32xf32>
    %c0_1 = arith.constant 0 : index
    %c0_2 = arith.constant 0 : index
    %1 = vector.load %arg1[%c0_1, %c0_2] : memref<2x32xf32, #tpu.memory_space<vmem>>, vector<2x32xf32>
    %c0_3 = arith.constant 0 : index
    %c0_4 = arith.constant 0 : index
    %c0_5 = arith.constant 0 : index
    %2 = vector.load %arg2[%c0_3, %c0_4, %c0_5] : memref<2x8x32xf32, #tpu.memory_space<vmem>>, vector<2x8x32xf32>
    %c0_6 = arith.constant 0 : index
    %c0_7 = arith.constant 0 : index
    %3 = vector.load %arg3[%c0_6, %c0_7] : memref<64x8xf32, #tpu.memory_space<vmem>>, vector<32x8xf32>
    %cst = arith.constant dense<0.000000e+00> : vector<2x8xf32>
    %4 = tpu.matmul %0, %3, %cst {dimension_numbers = #tpu.dot_dimension_numbers<[1], [0], [0], [1], [0, 0, 1, 1], [], []>} : vector<2x32xf32>, vector<32x8xf32>, vector<2x8xf32> -> vector<2x8xf32>
    %c32 = arith.constant 32 : index
    %c0_8 = arith.constant 0 : index
    %5 = vector.load %arg3[%c32, %c0_8] : memref<64x8xf32, #tpu.memory_space<vmem>>, vector<32x8xf32>
    %cst_9 = arith.constant dense<0.000000e+00> : vector<2x8xf32>
    %6 = tpu.matmul %1, %5, %cst_9 {dimension_numbers = #tpu.dot_dimension_numbers<[1], [0], [0], [1], [0, 0, 1, 1], [], []>} : vector<2x32xf32>, vector<32x8xf32>, vector<2x8xf32> -> vector<2x8xf32>
    %7 = arith.addf %4, %6 : vector<2x8xf32>
    %c0_10 = arith.constant 0 : index
    %c0_11 = arith.constant 0 : index
    %8 = vector.load %arg4[%c0_10, %c0_11] : memref<1x8xf32, #tpu.memory_space<vmem>>, vector<1x8xf32>
    %9 = vector.broadcast %8 : vector<1x8xf32> to vector<2x8xf32>
    %10 = arith.addf %7, %9 : vector<2x8xf32>
    %cst_12 = arith.constant dense<0xFF800000> : vector<2xf32>
    %11 = vector.multi_reduction <maximumf>, %10, %cst_12 [1] : vector<2x8xf32> to vector<2xf32>
    %12 = vector.shape_cast %11 : vector<2xf32> to vector<2x1xf32>
    %13 = vector.broadcast %12 : vector<2x1xf32> to vector<2x8xf32>
    %14 = arith.subf %10, %13 : vector<2x8xf32>
    %15 = math.exp %14 : vector<2x8xf32>
    %cst_13 = arith.constant dense<0.000000e+00> : vector<2xf32>
    %16 = vector.multi_reduction <add>, %15, %cst_13 [1] : vector<2x8xf32> to vector<2xf32>
    %17 = vector.shape_cast %16 : vector<2xf32> to vector<2x1xf32>
    %18 = tpu.reciprocal %17 : vector<2x1xf32> -> vector<2x1xf32>
    %19 = vector.broadcast %18 : vector<2x1xf32> to vector<2x8xf32>
    %20 = arith.mulf %15, %19 : vector<2x8xf32>
    %21 = vector.shape_cast %20 : vector<2x8xf32> to vector<2x1x8xf32>
    "tpu.trace_start"() <{level = 10 : i32, message = "bql,blh->bqh"}> : () -> ()
    %cst_14 = arith.constant dense<0.000000e+00> : vector<2x1x32xf32>
    %22 = tpu.matmul %21, %2, %cst_14 {dimension_numbers = #tpu.dot_dimension_numbers<[2], [1], [1], [2], [0, 0, 0, 1, 1, 2], [0], [0]>} : vector<2x1x8xf32>, vector<2x8x32xf32>, vector<2x1x32xf32> -> vector<2x1x32xf32>
    "tpu.trace_stop"() : () -> ()
    %23 = vector.shape_cast %22 : vector<2x1x32xf32> to vector<2x32xf32>
    %c0_15 = arith.constant 0 : index
    %c0_16 = arith.constant 0 : index
    %24 = vector.load %arg5[%c0_15, %c0_16] : memref<64x32xf32, #tpu.memory_space<vmem>>, vector<32x32xf32>
    %cst_17 = arith.constant dense<0.000000e+00> : vector<2x32xf32>
    %25 = tpu.matmul %0, %24, %cst_17 {dimension_numbers = #tpu.dot_dimension_numbers<[1], [0], [0], [1], [0, 0, 1, 1], [], []>} : vector<2x32xf32>, vector<32x32xf32>, vector<2x32xf32> -> vector<2x32xf32>
    %c32_18 = arith.constant 32 : index
    %c0_19 = arith.constant 0 : index
    %26 = vector.load %arg5[%c32_18, %c0_19] : memref<64x32xf32, #tpu.memory_space<vmem>>, vector<32x32xf32>
    %cst_20 = arith.constant dense<0.000000e+00> : vector<2x32xf32>
    %27 = tpu.matmul %23, %26, %cst_20 {dimension_numbers = #tpu.dot_dimension_numbers<[1], [0], [0], [1], [0, 0, 1, 1], [], []>} : vector<2x32xf32>, vector<32x32xf32>, vector<2x32xf32> -> vector<2x32xf32>
    %28 = arith.addf %25, %27 : vector<2x32xf32>
    %c0_21 = arith.constant 0 : index
    %c0_22 = arith.constant 0 : index
    %29 = vector.load %arg6[%c0_21, %c0_22] : memref<1x32xf32, #tpu.memory_space<vmem>>, vector<1x32xf32>
    %30 = vector.broadcast %29 : vector<1x32xf32> to vector<2x32xf32>
    %31 = arith.addf %28, %30 : vector<2x32xf32>
    %cst_23 = arith.constant 0.000000e+00 : f32
    %32 = vector.broadcast %cst_23 : f32 to vector<2x32xf32>
    %33 = arith.maximumf %31, %32 : vector<2x32xf32>
    %c0_24 = arith.constant 0 : index
    %c0_25 = arith.constant 0 : index
    %34 = vector.load %arg7[%c0_24, %c0_25] : memref<32x96xf32, #tpu.memory_space<vmem>>, vector<32x96xf32>
    %cst_26 = arith.constant dense<0.000000e+00> : vector<2x96xf32>
    %35 = tpu.matmul %33, %34, %cst_26 {dimension_numbers = #tpu.dot_dimension_numbers<[1], [0], [0], [1], [0, 0, 1, 1], [], []>} : vector<2x32xf32>, vector<32x96xf32>, vector<2x96xf32> -> vector<2x96xf32>
    %c0_27 = arith.constant 0 : index
    %c0_28 = arith.constant 0 : index
    %36 = vector.load %arg9[%c0_27, %c0_28] : memref<1x96xf32, #tpu.memory_space<vmem>>, vector<1x96xf32>
    %37 = vector.broadcast %36 : vector<1x96xf32> to vector<2x96xf32>
    %38 = arith.addf %35, %37 : vector<2x96xf32>
    %c0_29 = arith.constant 0 : index
    %c0_30 = arith.constant 0 : index
    %39 = vector.load %arg8[%c0_29, %c0_30] : memref<32x96xf32, #tpu.memory_space<vmem>>, vector<32x96xf32>
    %cst_31 = arith.constant dense<0.000000e+00> : vector<2x96xf32>
    %40 = tpu.matmul %1, %39, %cst_31 {dimension_numbers = #tpu.dot_dimension_numbers<[1], [0], [0], [1], [0, 0, 1, 1], [], []>} : vector<2x32xf32>, vector<32x96xf32>, vector<2x96xf32> -> vector<2x96xf32>
    %c0_32 = arith.constant 0 : index
    %c0_33 = arith.constant 0 : index
    %41 = vector.load %arg10[%c0_32, %c0_33] : memref<1x96xf32, #tpu.memory_space<vmem>>, vector<1x96xf32>
    %42 = vector.broadcast %41 : vector<1x96xf32> to vector<2x96xf32>
    %43 = arith.addf %40, %42 : vector<2x96xf32>
    %44 = vector.extract_strided_slice %38 {offsets = [0, 0], sizes = [2, 32], strides = [1, 1]} : vector<2x96xf32> to vector<2x32xf32>
    %45 = vector.extract_strided_slice %43 {offsets = [0, 0], sizes = [2, 32], strides = [1, 1]} : vector<2x96xf32> to vector<2x32xf32>
    %46 = arith.addf %44, %45 : vector<2x32xf32>
    %47 = arith.negf %46 : vector<2x32xf32>
    %48 = math.exp %47 : vector<2x32xf32>
    %cst_34 = arith.constant 1.000000e+00 : f32
    %49 = vector.broadcast %cst_34 : f32 to vector<2x32xf32>
    %50 = arith.addf %49, %48 : vector<2x32xf32>
    %51 = arith.divf %49, %50 : vector<2x32xf32>
    %52 = vector.extract_strided_slice %38 {offsets = [0, 32], sizes = [2, 32], strides = [1, 1]} : vector<2x96xf32> to vector<2x32xf32>
    %53 = vector.extract_strided_slice %43 {offsets = [0, 32], sizes = [2, 32], strides = [1, 1]} : vector<2x96xf32> to vector<2x32xf32>
    %54 = arith.addf %52, %53 : vector<2x32xf32>
    %55 = arith.negf %54 : vector<2x32xf32>
    %56 = math.exp %55 : vector<2x32xf32>
    %cst_35 = arith.constant 1.000000e+00 : f32
    %57 = vector.broadcast %cst_35 : f32 to vector<2x32xf32>
    %58 = arith.addf %57, %56 : vector<2x32xf32>
    %59 = arith.divf %57, %58 : vector<2x32xf32>
    %60 = vector.extract_strided_slice %38 {offsets = [0, 64], sizes = [2, 32], strides = [1, 1]} : vector<2x96xf32> to vector<2x32xf32>
    %61 = vector.extract_strided_slice %43 {offsets = [0, 64], sizes = [2, 32], strides = [1, 1]} : vector<2x96xf32> to vector<2x32xf32>
    %62 = arith.mulf %51, %61 : vector<2x32xf32>
    %63 = arith.addf %60, %62 : vector<2x32xf32>
    %64 = math.tanh %63 : vector<2x32xf32>
    %cst_36 = arith.constant 1.000000e+00 : f32
    %65 = vector.broadcast %cst_36 : f32 to vector<2x32xf32>
    %66 = arith.subf %65, %59 : vector<2x32xf32>
    %67 = arith.mulf %66, %64 : vector<2x32xf32>
    %68 = arith.mulf %59, %1 : vector<2x32xf32>
    %69 = arith.addf %67, %68 : vector<2x32xf32>
    %c0_37 = arith.constant 0 : index
    %c0_38 = arith.constant 0 : index
    %70 = vector.load %arg11[%c0_37, %c0_38] : memref<2x32xf32, #tpu.memory_space<vmem>>, vector<2x32xf32>
    tpu.vector_store %arg11[%c0_37, %c0_38], %69 {strides = array<i32>} : memref<2x32xf32, #tpu.memory_space<vmem>>, vector<2x32xf32>,
    return
  }
}

</mosaic_0001>

<bundles_post_ra>
// kernel: tpu_custom_call.1
= control target key start
LH: loop header
LB: loop body
LE: loop exit
PB: predicated region body
PF: predicated region fallthrough
CT: control target
= control target key end

     0   :  { %v926_v2 = vmov 0.0   ;;  %s1149_s0 = inlined_call_operand.vmem [shape: f32[2,32], index: 0, kind: input, shape index: {}]   ;;  %s1150_s1 = inlined_call_operand.vmem [shape: f32[2,32], index: 1, kind: input, shape index: {}]   ;;  %s1151_s2 = inlined_call_operand.vmem [shape: f32[2,8,32], index: 2, kind: input, shape index: {}]   ;;  %s1152_s3 = inlined_call_operand.vmem [shape: f32[64,8], index: 3, kind: input, shape index: {}]   ;;  %s1153_s4 = inlined_call_operand.vmem [shape: f32[1,8], index: 4, kind: input, shape index: {}]   ;;  %s1154_s5 = inlined_call_operand.vmem [shape: f32[64,32], index: 5, kind: input, shape index: {}]   ;;  %s1155_s6 = inlined_call_operand.vmem [shape: f32[1,32], index: 6, kind: input, shape index: {}]   ;;  %s1156_s7 = inlined_call_operand.vmem [shape: f32[32,96], index: 7, kind: input, shape index: {}]   ;;  %s1157_s8 = inlined_call_operand.vmem [shape: f32[32,96], index: 8, kind: input, shape index: {}]   ;;  %s1158_s9 = inlined_call_operand.vmem [shape: f32[1,96], index: 9, kind: input, shape index: {}]   ;;  %s1159_s10 = inlined_call_operand.vmem [shape: f32[1,96], index: 10, kind: input, shape index: {}]   ;;  %s1160_s11 = inlined_call_operand.hbm [shape: f32[2,32], index: 11, kind: output, shape index: {}]  }
   0x1   :  { %v50_v0 = vld [vmem:[%s1152_s3 + $0x38] sm:$0xff]  ;;  %811 = vmatprep.subr.mxu0 %v926_v2  ;;  %822 = vmatprep.subr.mxu1 %v926_v2  ;;  %v49_v3 = vld [vmem:[%s1152_s3 + $0x30] sm:$0xff]  ;;  %v48_v5 = vld [vmem:[%s1152_s3 + $0x28] sm:$0xff] }
   0x2   :  { %v46_v1 = vld [vmem:[%s1152_s3 + $0x18] sm:$0xff]  ;;  %v45_v4 = vld [vmem:[%s1152_s3 + $0x10] sm:$0xff]  ;;  %812 = vmatpush3.msra.mxu0 %v50_v0  ;;  %v44_v6 = vld [vmem:[%s1152_s3 + $0x8] sm:$0xff] }
   0x3   :  { %823 = vmatpush3.msra.mxu1 %v46_v1  ;;  %813 = vmatprep.subr.mxu0 %v926_v2 }
   0x4   :  { %824 = vmatprep.subr.mxu1 %v926_v2 }
   0x5   :  { %16 = vsyncpa [#allocation3], 0  ;;  %814 = vmatpush3.msra.mxu0 %v49_v3  ;;  %825 = vmatpush3.msra.mxu1 %v45_v4  ;;  %v47_v7 = vld [vmem:[%s1152_s3 + $0x20] sm:$0xff]  ;;  %vm51_vm0 = vcmask 261120   ;;  %vm927_vm1 = vmmov 0   ;;  %vm206_vm2 = vcmask 58368   ;;  %v222_v29 = vlaneseq }
   0x6   :  { %815 = vmatprep.subr.mxu0 %v926_v2  ;;  %826 = vmatprep.subr.mxu1 %v926_v2  ;;  %v43_v8 = vld [vmem:[%s1152_s3] sm:$0xff]  ;;  %v42_v24 = vld [vmem:[%s1151_s2 + $0x8] sm:$0xff]  ;;  %v928_v27 = vmov 1966171168   ;;  %vm241_vm3 = vcmask 64512   ;;  %v393_v38 = vld [vmem:[%s1154_s5 + $0x38] sm:$0xff] }
   0x7   :  { %816 = vmatpush3.msra.mxu0 %v48_v5  ;;  %827 = vmatpush3.msra.mxu1 %v44_v6  ;;  %v1028_v9 = vld [vmem:[%s1150_s1] sm:$0x3]  ;;  %v220_v28 = vunpack.c.l.s4 %v928_v27  ;;  %v223_v31 = vshrl.u32 %v222_v29, 7  ;;  %v389_v40 = vld [vmem:[%s1154_s5 + $0x18] sm:$0xff]  ;;  %v388_v41 = vld [vmem:[%s1154_s5 + $0x10] sm:$0xff]  ;;  %vm397_vm4 = vcmask 1041409  }
   0x8   :  { %817 = vmatprep.subr.mxu0 %v926_v2  ;;  %828 = vmatprep.subr.mxu1 %v926_v2  ;;  %v1033_v10 = vld [vmem:[%s1149_s0] sm:$0x3]  ;;  %v392_v42 = vld [vmem:[%s1154_s5 + $0x30] sm:$0xff]  ;;  %v387_v43 = vld [vmem:[%s1154_s5 + $0x8] sm:$0xff]  ;;  %s929_s27 = smov 64   ;;  %vm748_vm5 = vcmask 254976  }
   0x9   :  { %818 = vmatpush3.msra.mxu0 %v47_v7  ;;  %819 = vmatprep.mubr.msk.f32.mxu0 %vm927_vm1, %v926_v2  ;;  %v766_v13 = vld [vmem:[%s1153_s4] ss:$0 sm:$0xff]  ;;  %v221_v30 = vunpack.c.0.s8 %v220_v28  ;;  %v391_v44 = vld [vmem:[%s1154_s5 + $0x28] sm:$0xff]  ;;  %v637_v47 = vld [vmem:[%s1157_s8 + $0x18] sm:$0xff] }
   0xa   :  { %829 = vmatpush3.msra.mxu1 %v43_v8  ;;  %830 = vmatprep.mubr.msk.f32.mxu1 %vm927_vm1, %v926_v2  ;;  %v41_v25 = vld [vmem:[%s1151_s2] sm:$0xff]  ;;  %v636_v48 = vld [vmem:[%s1157_s8 + $0x10] sm:$0xff]  ;;  %v635_v49 = vld [vmem:[%s1157_s8 + $0x8] sm:$0xff] }
   0xb   :  { %820 = vmatmul.mubr.msk.f32.vlgmr.msra.gmra.mxu0 %vm51_vm0, %v1028_v9  ;;  %831 = vmatmul.mubr.msk.f32.vlgmr.msra.gmra.mxu1 %vm51_vm0, %v1033_v10  ;;  %v224_v32 = vsub.s32 %v221_v30, %v223_v31  ;;  %v386_v45 = vld [vmem:[%s1154_s5] sm:$0xff]  ;;  %v553_v58 = vld [vmem:[%s1156_s7 + $0x18] sm:$0xff]  ;;  %v552_v60 = vld [vmem:[%s1156_s7 + $0x10] sm:$0xff] }
   0xc   :  { %838 = vmatprep.subr.mxu1 %v926_v2  ;;  %833 = vmatprep.subr.mxu0 %v926_v2  ;;  %v390_v46 = vld [vmem:[%s1154_s5 + $0x20] sm:$0xff]  ;;  %v551_v61 = vld [vmem:[%s1156_s7 + $0x8] sm:$0xff] }
   0xd   :  { %835 = vmatprep.mubr.msk.f32.mxu0 %vm927_vm1, %v926_v2  ;;  %840 = vmatprep.mubr.msk.f32.mxu1 %vm927_vm1, %v926_v2  ;;  %v634_v50 = vld [vmem:[%s1157_s8] sm:$0xff] }
   0xe   :  { %839 = vmatpush3.msra.mxu1 %v42_v24  ;;  %834 = vmatpush3.msra.mxu0 %v41_v25  ;;  %v550_v62 = vld [vmem:[%s1156_s7] sm:$0xff] }
   0xf   :  { %854 = vmatprep.subr.mxu1 %v926_v2  ;;  %843 = vmatprep.subr.mxu0 %v926_v2  ;;  %v774_v63 = vld [vmem:[%s1159_s10] ss:$0 sm:$0xff]  ;;  %s932_s10 = smov [#allocation2]  }
  0x10   :  { %v771_v5 = vld [vmem:[%s1155_s6] ss:$0 sm:$0xff]  ;;  %s930_s6 = smov 32   ;;  %s756_s12 = sshll.u32 %s932_s10, 4  ;;  %s757_s12 = int_to_ptr.vmem [resolvable:$true] %s756_s12 }
  0x11   :  { %s904_s13 = scalar_lea.vmem %s757_s12, 32  ;;  %p909_p1 = scmp.lt.s32.totalorder %s757_s12, %s757_s12 }
  0x12   :  { %p905_p0 = scmp.ne.s32.totalorder %s757_s12, %s904_s13  ;;  %p910_p2 = scmp.lt.s32.totalorder %s904_s13, %s904_s13 }
  0x14   :  { %p911_p3 = por %p910_p2, %p909_p1 }
  0x16   :  { %p912_p4 = pnand %p911_p3, %p905_p0 }
  0xcb   :  { %v121_v11 = vpop.f32.mrf.mxu0  ;;  %v194_v12 = vpop.f32.mrf.mxu1 }
  0xcc   :  { %v195_v14 = vadd.f32 %v194_v12, %v121_v11 }
  0xcd   :  { %v821_v15 = vpop.f32.mrf.mxu0  ;;  %v832_v16 = vpop.f32.mrf.mxu1 }
  0xce   :  { %v205_v17 = vadd.f32 %v766_v13, %v195_v14 }
  0xd0   :  { %v207_v18 = vsel %vm206_vm2, %v205_v17, -inf }
  0xd1   :  { %208 = vmax.xlane.f32.xlu0 %v207_v18 }
 0x15a   :  { %v209_v19 = vpop.xlane.xlu0 %208 }
 0x15b   :  { %v210_v20 = vsub.f32 %v205_v17, %v209_v19 }
 0x15d   :  { %v211_v21 = vmul.f32 1.442695, %v210_v20 }
 0x15f   :  { %894 = vpow2.f32 %v211_v21 }
 0x16c   :  { %v895_v22 = vpop.eup %894 }
 0x16d   :  { %v213_v23 = vsel %vm206_vm2, %v895_v22, 0.0 }
 0x16e   :  { %214 = vadd.xlane.f32.xlu0 %v213_v23 }
 0x1f7   :  { %v215_v26 = vpop.xlane.xlu0 %214 }
 0x1f8   :  { %896 = vrcp.f32 %v215_v26 }
 0x205   :  { %v897_v33 = vpop.eup %896 }
 0x206   :  { %v217_v34 = vmul.f32 %v897_v33, %v895_v22 }
 0x208   :  { %v225_v35 = vrot.slane %v217_v34, %v224_v32 }
 0x20a   :  { %v233_v36 = vrot.slane %v225_v35, %v224_v32  ;;  %v226_v37 = vcombine.high %v225_v35, %v225_v35 }
 0x20c   :  { %836 = vmatmul.mubr.msk.f32.vlgmr.msra.gmra.mxu0 %vm241_vm3, %v233_v36  ;;  %v240_v39 = vrot.slane %v226_v37, %v224_v32 }
 0x20d   :  { %844 = vmatpush3.msra.mxu0 %v393_v38  ;;  %851 = vmatprep.mubr.msk.f32.mxu0 %vm927_vm1, %v926_v2 }
 0x20e   :  { %841 = vmatmul.mubr.msk.f32.vlgmr.msra.gmra.mxu1 %vm241_vm3, %v240_v39  ;;  %845 = vmatprep.subr.mxu0 %v926_v2 }
 0x20f   :  { %855 = vmatpush3.msra.mxu1 %v389_v40  ;;  %862 = vmatprep.mubr.msk.f32.mxu1 %vm927_vm1, %v926_v2 }
 0x210   :  { %856 = vmatprep.subr.mxu1 %v926_v2  ;;  %846 = vmatpush3.msra.mxu0 %v392_v42 }
 0x211   :  { %857 = vmatpush3.msra.mxu1 %v388_v41  ;;  %847 = vmatprep.subr.mxu0 %v926_v2 }
 0x212   :  { %858 = vmatprep.subr.mxu1 %v926_v2  ;;  %848 = vmatpush3.msra.mxu0 %v391_v44 }
 0x213   :  { %859 = vmatpush3.msra.mxu1 %v387_v43  ;;  %849 = vmatprep.subr.mxu0 %v926_v2 }
 0x214   :  { %860 = vmatprep.subr.mxu1 %v926_v2  ;;  %850 = vmatpush3.msra.mxu0 %v390_v46 }
 0x215   :  { %861 = vmatpush3.msra.mxu1 %v386_v45  ;;  %865 = vmatprep.subr.mxu0 %v926_v2 }
 0x216   :  { %863 = vmatmul.mubr.msk.f32.vlgmr.msra.gmra.mxu1 %vm51_vm0, %v1033_v10  ;;  %876 = vmatprep.subr.mxu1 %v926_v2  ;;  %v772_v10 = vld [vmem:[%s1158_s9] ss:$0 sm:$0xff]  ;;  %s931_s9 = smov 96  }
 0x217   :  { %884 = vmatprep.mubr.msk.f32.mxu1 %vm927_vm1, %v926_v2  ;;  %877 = vmatpush3.msra.mxu1 %v637_v47 }
 0x218   :  { %878 = vmatprep.subr.mxu1 %v926_v2 }
 0x219   :  { %879 = vmatpush3.msra.mxu1 %v636_v48 }
 0x21a   :  { %880 = vmatprep.subr.mxu1 %v926_v2 }
 0x21b   :  { %881 = vmatpush3.msra.mxu1 %v635_v49 }
 0x21c   :  { %882 = vmatprep.subr.mxu1 %v926_v2 }
 0x21d   :  { %883 = vmatpush3.msra.mxu1 %v634_v50 }
 0x21e   :  { %885 = vmatmul.mubr.msk.f32.vlgmr.msra.gmra.mxu1 %vm51_vm0, %v1028_v9 }
 0x2cc   :  { %v310_v51 = vpop.f32.mrf.mxu0 }
 0x2ce   :  { %v837_v52 = vpop.f32.mrf.mxu0  ;;  %v382_v53 = vpop.f32.mrf.mxu1 }
 0x2cf   :  { %v396_v54 = vrot.slane %v382_v53, 7 }
 0x2d0   :  { %v842_v55 = vpop.f32.mrf.mxu1 }
 0x2d1   :  { %v398_v56 = vsel %vm397_vm4, %v396_v54, %v310_v51 }
 0x2d2   :  { %852 = vmatmul.mubr.msk.f32.vlgmr.msra.gmra.mxu0 %vm51_vm0, %v398_v56 }
 0x2d3   :  { %873 = vmatprep.mubr.msk.f32.mxu0 %vm927_vm1, %v926_v2  ;;  %866 = vmatpush3.msra.mxu0 %v553_v58 }
 0x2d4   :  { %867 = vmatprep.subr.mxu0 %v926_v2 }
 0x2d5   :  { %868 = vmatpush3.msra.mxu0 %v552_v60 }
 0x2d6   :  { %v537_v57 = vpop.f32.mrf.mxu1  ;;  %869 = vmatprep.subr.mxu0 %v926_v2 }
 0x2d7   :  { %870 = vmatpush3.msra.mxu0 %v551_v61 }
 0x2d8   :  { %v864_v59 = vpop.f32.mrf.mxu1  ;;  %871 = vmatprep.subr.mxu0 %v926_v2 }
 0x2d9   :  { %872 = vmatpush3.msra.mxu0 %v550_v62 }
 0x2de   :  { %v711_v0 = vpop.f32.mrf.mxu1 }
 0x2df   :  { %v712_v1 = vadd.f32 %v774_v63, %v711_v0 }
 0x2e0   :  { %v886_v3 = vpop.f32.mrf.mxu1 }
 0x2e1   :  { %723 = vrot.lane.b32.xlu1 %v712_v1, %s929_s27 }
 0x353   :  { %v724_v18 = vpop.permute.xlu1 %723 }
 0x392   :  { %v467_v4 = vpop.f32.mrf.mxu0 }
 0x393   :  { %v538_v2 = vadd.f32 %v537_v57, %v467_v4 }
 0x394   :  { %v853_v6 = vpop.f32.mrf.mxu0 }
 0x395   :  { %v548_v7 = vadd.f32 %v771_v5, %v538_v2 }
 0x397   :  { %v549_v8 = vmax.f32 %v548_v7, 0.0 }
 0x399   :  { %874 = vmatmul.mubr.msk.f32.vlgmr.msra.gmra.mxu0 %vm51_vm0, %v549_v8 }
 0x459   :  { %v630_v11 = vpop.f32.mrf.mxu0 }
 0x45a   :  { %v631_v12 = vadd.f32 %v772_v10, %v630_v11 }
 0x45b   :  { %v875_v13 = vpop.f32.mrf.mxu0 }
 0x45c   :  { %v715_v14 = vadd.f32 %v712_v1, %v631_v12 }
 0x45e   :  { %v776_v15 = vmul.f32 -1.442695, %v715_v14 }
 0x460   :  { %898 = vpow2.f32 %v776_v15 }
 0x46d   :  { %v899_v16 = vpop.eup %898 }
 0x46e   :  { %v719_v17 = vadd.f32 1.0, %v899_v16 }
 0x470   :  { %900 = vrcp.f32 %v719_v17 }
 0x47d   :  { %v901_v19 = vpop.eup %900 }
 0x47e   :  { %v726_v20 = vmul.f32 %v901_v19, %v724_v18  ;;  %v733_v25 = vsub.f32 1.0, %v901_v19 }
 0x480   :  { %728 = vrot.lane.b32.xlu1 %v726_v20, %s929_s27 }
 0x484   :  { %739 = vrot.lane.b32.xlu1 %v1028_v9, %s930_s6 }
 0x4f2   :  { %v729_v21 = vpop.permute.xlu1 %728 }
 0x4f3   :  { %v731_v22 = vadd.f32 %v729_v21, %v631_v12 }
 0x4f5   :  { %902 = vtanh.f32 %v731_v22 }
 0x4f6   :  { %v740_v24 = vpop.permute.xlu1 %739 }
 0x4f7   :  { %v742_v27 = vmul.f32 %v901_v19, %v740_v24 }
 0x502   :  { %v903_v23 = vpop.eup %902 }
 0x503   :  { %735 = vrot.lane.b32.xlu0 %v903_v23, %s931_s9 }
 0x575   :  { %v736_v26 = vpop.permute.xlu0 %735 }
 0x576   :  { %v738_v28 = vmul.f32 %v736_v26, %v733_v25 }
 0x578   :  { %v743_v29 = vadd.f32 %v742_v27, %v738_v28 }
 0x57a   :  { %745 = vrot.lane.b32.xlu1 %v743_v29, %s931_s9 }
 0x5ec   :  { %v746_v30 = vpop.permute.xlu1 %745 }
 0x5ed   :  { %749 = vst.msk [vmem:[#allocation2] sm:$0x3] %vm748_vm5, %v746_v30 }
 0x5ee   :  { %915 = shalt.err (!%p912_p4)
}
 0x5ef   :  { %759 = dma.vmem_to_hbm [thread:$0]  %s757_s12, 32, %s1160_s11, [#allocation3]  }
 0x5f0   :  { %924 = dma.done.wait [#allocation3], 32  }
 0x5f1   :  { %925 = vsyncadd [#allocation3], 4294967264 }
 0x5f2   :  { %763 = vsyncpa [#allocation3], 1 }

</bundles_post_ra>
